<compile_context>
chip_gen: v7x
topology: tpu7x:2x2x1
jax: 0.10.0
libtpu: 0.0.40
codegen_flags: <defaults>
</compile_context>

<pallas_src>
import jax
import jax.numpy as jnp
from jax.experimental import pallas as pl
from jax.experimental.pallas import tpu as pltpu


# ------------------------------ Pallas kernel ------------------------------ #

def _fused_affine_cfg_kernel(x_ref, a_ref, b_ref, o_ref):
    # x_ref : VMEM (R, HW)  activations, row r = b*C + c     (R = B*C)
    # a_ref : VMEM (R, R)   coefficient matrix (identity + sv*w, block-diagonal
    #                       over the batch), built in the jitted wrapper
    # b_ref : VMEM (R, 1)   effective per-row bias with the CFG combine already
    #                       folded in: b_eff = bu + cond_scale*(bc - bu)
    # o_ref : VMEM (R, HW)  output, o = A @ x + b_eff
    r = a_ref.shape[0]
    a = a_ref[...]                                    # (R, R): tiny, lives in vregs
    # R full-width VPU FMAs: (R,1) column of A times a sublane-broadcast row of x.
    acc = a[:, 0:1] * x_ref[0:1, :]
    for ri in range(1, r):                            # static unroll (R = 8)
        acc = acc + a[:, ri:ri + 1] * x_ref[ri:ri + 1, :]
    # Single unmasked full-tile store; bias broadcast along lanes.
    o_ref[...] = acc + b_ref[...]


def _fused_affine_cfg(x2, coef, b_eff):
    """x2: (R, HW) f32; coef: (R, R) f32; b_eff: (R, 1) f32 -> (R, HW) f32."""
    r, hw = x2.shape
    return pl.pallas_call(
        _fused_affine_cfg_kernel,
        out_shape=jax.ShapeDtypeStruct((r, hw), jnp.float32),
        grid=(1,),                                           # single step: whole
        in_specs=[                                           # problem ~16 KiB
            pl.BlockSpec((r, hw), lambda i: (0, 0)),         # x     (8, 256)
            pl.BlockSpec((r, r), lambda i: (0, 0)),          # A     (8, 8)
            pl.BlockSpec((r, 1), lambda i: (0, 0)),          # b_eff (8, 1)
        ],
        out_specs=pl.BlockSpec((r, hw), lambda i: (0, 0)),
        compiler_params=pltpu.CompilerParams(
            dimension_semantics=("arbitrary",)),
    )(x2, coef, b_eff)


# --------------------------- wrapper-side folding --------------------------- #

def _make_bias(ctx, y, w_ctx, w_y):
    # (N, T, Dctx) -> (N, C) conditioning bias (tiny matmuls, left to XLA).
    return jnp.mean(ctx.astype(jnp.float32), axis=1) @ w_ctx \
        + y.astype(jnp.float32) @ w_y


def _build_coef(sv, w, b, c):
    """Block-diagonal (B*C, B*C) matrix A:
    A[r_out, r_in] = delta(r_out, r_in) + sv[batch]*w[c_in, c_out] within a
    batch, 0 across batches (rows/cols indexed r = batch*C + channel)."""
    r = b * c
    rows = jnp.arange(r)
    same_batch = (rows[:, None] // c) == (rows[None, :] // c)
    w_term = jnp.tile(jnp.swapaxes(w, 0, 1), (b, b))   # [r_out, r_in] = w[c_in, c_out]
    sv_rows = jnp.repeat(sv, c)                        # (R,) = sv[batch(r)]
    mix = jnp.where(same_batch, sv_rows[:, None] * w_term, 0.0)
    return mix + jnp.eye(r, dtype=jnp.float32)


@jax.jit
def _cfg_forward(x, sigma, c_ctx, c_y, u_ctx, u_y, cond_scale, w, w_ctx, w_y):
    """Fused equivalent of: cat -> apply_model -> chunk -> u + (c-u)*scale."""
    b, c, h, wd = x.shape
    hw = h * wd
    x2 = x.astype(jnp.float32).reshape(b * c, hw)             # NCHW collapse only
    sv = 1.0 / (sigma.astype(jnp.float32) ** 2 + 1.0)          # (B,)
    bias_c = _make_bias(c_ctx, c_y, w_ctx, w_y)                # (B, C)
    bias_u = _make_bias(u_ctx, u_y, w_ctx, w_y)                # (B, C)
    cs = jnp.asarray(cond_scale, jnp.float32)
    b_eff = (bias_u + (bias_c - bias_u) * cs).reshape(b * c, 1)
    coef = _build_coef(sv, w, b, c)
    out2 = _fused_affine_cfg(x2, coef, b_eff)
    return out2.reshape(b, c, h, wd)


@jax.jit
def _apply_model_jit(x, sigma, bias, w):
    """Backbone only (no CFG): out = x + sv * (x channel-mix w) + bias."""
    n, c, h, wd = x.shape
    hw = h * wd
    x2 = x.astype(jnp.float32).reshape(n * c, hw)
    sv = 1.0 / (sigma.astype(jnp.float32) ** 2 + 1.0)
    coef = _build_coef(sv, w, n, c)
    b2 = bias.astype(jnp.float32).reshape(n * c, 1)
    return _fused_affine_cfg(x2, coef, b2).reshape(n, c, h, wd)


# -------------------------- Synthetic SD3 backbone ------------------------- #

class SyntheticMMDiT:
    """Deterministic stand-in for the diffusion backbone (`self.model`)."""

    def __init__(self, key, channels, ctx_dim, y_dim):
        k1, k2, k3 = jax.random.split(key, 3)
        self.w = 0.1 * jax.random.normal(k1, (channels, channels), jnp.float32)
        self.w_ctx = 0.1 * jax.random.normal(k2, (ctx_dim, channels), jnp.float32)
        self.w_y = 0.1 * jax.random.normal(k3, (y_dim, channels), jnp.float32)

    def apply_model(self, x, sigma, c_crossattn, y):
        bias = _make_bias(c_crossattn, y, self.w_ctx, self.w_y)
        return _apply_model_jit(x, sigma, bias, self.w)

    def __call__(self, x, sigma):
        n, c = x.shape[0], x.shape[1]
        return _apply_model_jit(x, sigma, jnp.zeros((n, c), jnp.float32), self.w)


# ------------------------------- CFGDenoiser ------------------------------- #

class CFGDenoiser:
    """JAX/Pallas port of the PyTorch CFGDenoiser forward pass."""

    def __init__(self, model, steps=None, skip_layer_config=None,
                 progress_callback=None):
        self.model = model
        self.steps = steps
        self.skip_layer_config = skip_layer_config or {}
        self.progress_callback = progress_callback
        self.current_step = 0

    def forward(self, x, sigma, cond=None, uncond=None, cond_scale=None,
                **kwargs):
        self.current_step += 1
        if self.progress_callback is not None:
            total_steps = self.steps or 1
            self.progress_callback(self.current_step, total_steps)
        if cond is None or uncond is None:
            return self.model(x, sigma, **kwargs)

        # Fused CFG path. Mathematically identical to the reference sequence
        #   x_in = cat([x]*2); out = apply_model(x_in, ...); c,u = chunk(out)
        #   return u + (c - u) * cond_scale
        # but reads x once and does the combine via the folded effective bias.
        return _cfg_forward(
            x, sigma,
            cond['c_crossattn'], cond['y'],
            uncond['c_crossattn'], uncond['y'],
            jnp.asarray(cond_scale, jnp.float32),
            self.model.w, self.model.w_ctx, self.model.w_y)

    __call__ = forward


# --------------------------------- driver ---------------------------------- #

def _reference(model, x, sigma, cond, uncond, cond_scale):
    """Pure-JAX reference mirroring the original (un-fused) torch semantics."""
    x_in = jnp.concatenate([x] * 2)
    sigma_in = jnp.concatenate([sigma] * 2)
    ctxattn = jnp.concatenate([cond['c_crossattn'], uncond['c_crossattn']])
    y = jnp.concatenate([cond['y'], uncond['y']])
    b2, c, h, w = x_in.shape
    x_flat = jnp.transpose(x_in, (0, 2, 3, 1)).reshape(b2, h * w, c)
    scale = 1.0 / (sigma_in ** 2 + 1.0)
    bias = jnp.mean(ctxattn, axis=1) @ model.w_ctx + y @ model.w_y
    out_flat = x_flat + scale[:, None, None] * (x_flat @ model.w) + bias[:, None, :]
    out = jnp.transpose(out_flat.reshape(b2, h, w, c), (0, 3, 1, 2))
    oc, ou = jnp.split(out, 2, axis=0)
    return ou + (oc - ou) * cond_scale


if __name__ == "__main__":
    B, C, H, W = 2, 4, 16, 16     # latent-ish NCHW input
    T, D_CTX, D_Y = 8, 32, 32     # crossattn seq/dim, pooled-embedding dim
    COND_SCALE = 5.0

    key = jax.random.PRNGKey(0)
    k_model, kx, ks, kc1, ky1, kc2, ky2 = jax.random.split(key, 7)

    model = SyntheticMMDiT(k_model, channels=C, ctx_dim=D_CTX, y_dim=D_Y)
    denoiser = CFGDenoiser(model, steps=10,
                           progress_callback=lambda step, total: None)

    x = jax.random.normal(kx, (B, C, H, W), jnp.float32)
    sigma = jax.nn.softplus(jax.random.normal(ks, (B,), jnp.float32))
    cond = {
        'c_crossattn': jax.random.normal(kc1, (B, T, D_CTX), jnp.float32),
        'y': jax.random.normal(ky1, (B, D_Y), jnp.float32),
    }
    uncond = {
        'c_crossattn': jax.random.normal(kc2, (B, T, D_CTX), jnp.float32),
        'y': jax.random.normal(ky2, (B, D_Y), jnp.float32),
    }

    out = denoiser(x, sigma, cond=cond, uncond=uncond, cond_scale=COND_SCALE)
    out = jax.block_until_ready(out)

    ref = _reference(model, x, sigma, cond, uncond, COND_SCALE)
    assert out.shape == (B, C, H, W)
    assert jnp.allclose(out, ref, atol=1e-3, rtol=1e-3), "mismatch vs reference"

    print("KERNEL_OK")
</pallas_src>

<mosaic_0001>
module attributes {stable_mosaic.version = 11 : i64} {
  func.func @_fused_affine_cfg_kernel(%arg0: i32, %arg1: memref<8x256xf32, #tpu.memory_space<vmem>>, %arg2: memref<8x8xf32, #tpu.memory_space<vmem>>, %arg3: memref<8x1xf32, #tpu.memory_space<vmem>>, %arg4: memref<8x256xf32, #tpu.memory_space<vmem>>) attributes {dimension_semantics = [#tpu.dimension_semantics<arbitrary>], iteration_bounds = array<i64: 1>, scalar_prefetch = 0 : i64, scratch_operands = 0 : i64, tpu.core_type = #tpu.core_type<tc>, window_params = [{pipeline_mode = #tpu.pipeline_mode<synchronous>, transform_indices = @transform_0, window_bounds = array<i64: 8, 256>}, {pipeline_mode = #tpu.pipeline_mode<synchronous>, transform_indices = @transform_1, window_bounds = array<i64: 8, 8>}, {pipeline_mode = #tpu.pipeline_mode<synchronous>, transform_indices = @transform_2, window_bounds = array<i64: 8, 1>}, {pipeline_mode = #tpu.pipeline_mode<synchronous>, transform_indices = @transform_3, window_bounds = array<i64: 8, 256>}]} {
    %c0 = arith.constant 0 : index
    %c0_0 = arith.constant 0 : index
    %0 = vector.load %arg2[%c0, %c0_0] : memref<8x8xf32, #tpu.memory_space<vmem>>, vector<8x8xf32>
    %1 = vector.extract_strided_slice %0 {offsets = [0, 0], sizes = [8, 1], strides = [1, 1]} : vector<8x8xf32> to vector<8x1xf32>
    %c0_1 = arith.constant 0 : index
    %c0_2 = arith.constant 0 : index
    %2 = vector.load %arg1[%c0_1, %c0_2] : memref<8x256xf32, #tpu.memory_space<vmem>>, vector<1x256xf32>
    %3 = vector.broadcast %1 : vector<8x1xf32> to vector<8x256xf32>
    %4 = vector.broadcast %2 : vector<1x256xf32> to vector<8x256xf32>
    %5 = arith.mulf %3, %4 : vector<8x256xf32>
    %6 = vector.extract_strided_slice %0 {offsets = [0, 1], sizes = [8, 1], strides = [1, 1]} : vector<8x8xf32> to vector<8x1xf32>
    %c1 = arith.constant 1 : index
    %c0_3 = arith.constant 0 : index
    %7 = vector.load %arg1[%c1, %c0_3] : memref<8x256xf32, #tpu.memory_space<vmem>>, vector<1x256xf32>
    %8 = vector.broadcast %6 : vector<8x1xf32> to vector<8x256xf32>
    %9 = vector.broadcast %7 : vector<1x256xf32> to vector<8x256xf32>
    %10 = arith.mulf %8, %9 : vector<8x256xf32>
    %11 = arith.addf %5, %10 : vector<8x256xf32>
    %12 = vector.extract_strided_slice %0 {offsets = [0, 2], sizes = [8, 1], strides = [1, 1]} : vector<8x8xf32> to vector<8x1xf32>
    %c2 = arith.constant 2 : index
    %c0_4 = arith.constant 0 : index
    %13 = vector.load %arg1[%c2, %c0_4] : memref<8x256xf32, #tpu.memory_space<vmem>>, vector<1x256xf32>
    %14 = vector.broadcast %12 : vector<8x1xf32> to vector<8x256xf32>
    %15 = vector.broadcast %13 : vector<1x256xf32> to vector<8x256xf32>
    %16 = arith.mulf %14, %15 : vector<8x256xf32>
    %17 = arith.addf %11, %16 : vector<8x256xf32>
    %18 = vector.extract_strided_slice %0 {offsets = [0, 3], sizes = [8, 1], strides = [1, 1]} : vector<8x8xf32> to vector<8x1xf32>
    %c3 = arith.constant 3 : index
    %c0_5 = arith.constant 0 : index
    %19 = vector.load %arg1[%c3, %c0_5] : memref<8x256xf32, #tpu.memory_space<vmem>>, vector<1x256xf32>
    %20 = vector.broadcast %18 : vector<8x1xf32> to vector<8x256xf32>
    %21 = vector.broadcast %19 : vector<1x256xf32> to vector<8x256xf32>
    %22 = arith.mulf %20, %21 : vector<8x256xf32>
    %23 = arith.addf %17, %22 : vector<8x256xf32>
    %24 = vector.extract_strided_slice %0 {offsets = [0, 4], sizes = [8, 1], strides = [1, 1]} : vector<8x8xf32> to vector<8x1xf32>
    %c4 = arith.constant 4 : index
    %c0_6 = arith.constant 0 : index
    %25 = vector.load %arg1[%c4, %c0_6] : memref<8x256xf32, #tpu.memory_space<vmem>>, vector<1x256xf32>
    %26 = vector.broadcast %24 : vector<8x1xf32> to vector<8x256xf32>
    %27 = vector.broadcast %25 : vector<1x256xf32> to vector<8x256xf32>
    %28 = arith.mulf %26, %27 : vector<8x256xf32>
    %29 = arith.addf %23, %28 : vector<8x256xf32>
    %30 = vector.extract_strided_slice %0 {offsets = [0, 5], sizes = [8, 1], strides = [1, 1]} : vector<8x8xf32> to vector<8x1xf32>
    %c5 = arith.constant 5 : index
    %c0_7 = arith.constant 0 : index
    %31 = vector.load %arg1[%c5, %c0_7] : memref<8x256xf32, #tpu.memory_space<vmem>>, vector<1x256xf32>
    %32 = vector.broadcast %30 : vector<8x1xf32> to vector<8x256xf32>
    %33 = vector.broadcast %31 : vector<1x256xf32> to vector<8x256xf32>
    %34 = arith.mulf %32, %33 : vector<8x256xf32>
    %35 = arith.addf %29, %34 : vector<8x256xf32>
    %36 = vector.extract_strided_slice %0 {offsets = [0, 6], sizes = [8, 1], strides = [1, 1]} : vector<8x8xf32> to vector<8x1xf32>
    %c6 = arith.constant 6 : index
    %c0_8 = arith.constant 0 : index
    %37 = vector.load %arg1[%c6, %c0_8] : memref<8x256xf32, #tpu.memory_space<vmem>>, vector<1x256xf32>
    %38 = vector.broadcast %36 : vector<8x1xf32> to vector<8x256xf32>
    %39 = vector.broadcast %37 : vector<1x256xf32> to vector<8x256xf32>
    %40 = arith.mulf %38, %39 : vector<8x256xf32>
    %41 = arith.addf %35, %40 : vector<8x256xf32>
    %42 = vector.extract_strided_slice %0 {offsets = [0, 7], sizes = [8, 1], strides = [1, 1]} : vector<8x8xf32> to vector<8x1xf32>
    %c7 = arith.constant 7 : index
    %c0_9 = arith.constant 0 : index
    %43 = vector.load %arg1[%c7, %c0_9] : memref<8x256xf32, #tpu.memory_space<vmem>>, vector<1x256xf32>
    %44 = vector.broadcast %42 : vector<8x1xf32> to vector<8x256xf32>
    %45 = vector.broadcast %43 : vector<1x256xf32> to vector<8x256xf32>
    %46 = arith.mulf %44, %45 : vector<8x256xf32>
    %47 = arith.addf %41, %46 : vector<8x256xf32>
    %c0_10 = arith.constant 0 : index
    %c0_11 = arith.constant 0 : index
    %48 = vector.load %arg3[%c0_10, %c0_11] : memref<8x1xf32, #tpu.memory_space<vmem>>, vector<8x1xf32>
    %49 = vector.broadcast %48 : vector<8x1xf32> to vector<8x256xf32>
    %50 = arith.addf %47, %49 : vector<8x256xf32>
    %c0_12 = arith.constant 0 : index
    %c0_13 = arith.constant 0 : index
    %51 = vector.load %arg4[%c0_12, %c0_13] : memref<8x256xf32, #tpu.memory_space<vmem>>, vector<8x256xf32>
    tpu.vector_store %arg4[%c0_12, %c0_13], %50 {strides = array<i32>} : memref<8x256xf32, #tpu.memory_space<vmem>>, vector<8x256xf32>,
    return
  }
  func.func @transform_0(%arg0: i32) -> (i32, i32) {
    %c0_i32 = arith.constant 0 : i32
    %c0_i32_0 = arith.constant 0 : i32
    %c0_i32_1 = arith.constant 0 : i32
    return %c0_i32, %c0_i32_0 : i32, i32
  }
  func.func @transform_1(%arg0: i32) -> (i32, i32) {
    %c0_i32 = arith.constant 0 : i32
    %c0_i32_0 = arith.constant 0 : i32
    %c0_i32_1 = arith.constant 0 : i32
    return %c0_i32, %c0_i32_0 : i32, i32
  }
  func.func @transform_2(%arg0: i32) -> (i32, i32) {
    %c0_i32 = arith.constant 0 : i32
    %c0_i32_0 = arith.constant 0 : i32
    %c0_i32_1 = arith.constant 0 : i32
    return %c0_i32, %c0_i32_0 : i32, i32
  }
  func.func @transform_3(%arg0: i32) -> (i32, i32) {
    %c0_i32 = arith.constant 0 : i32
    %c0_i32_0 = arith.constant 0 : i32
    %c0_i32_1 = arith.constant 0 : i32
    return %c0_i32, %c0_i32_0 : i32, i32
  }
}

</mosaic_0001>

<bundles_post_ra>
// kernel: mul.9
= control target key start
LH: loop header
LB: loop body
LE: loop exit
PB: predicated region body
PF: predicated region fallthrough
CT: control target
= control target key end

     0   :  { %vm7_vm0 = vcmask 31744   ;;  %vm13_vm1 = vcmask 64544   ;;  %s39_s0 = inlined_call_operand.vmem [shape: f32[2,4], index: 0, kind: input, shape index: {}]   ;;  %s40_s1 = inlined_call_operand.vmem [shape: f32[8], index: 1, kind: output, shape index: {}]  }
   0x1   :  { %v4_v0 = vld [vmem:[%s39_s0] sm:$0x3]  ;;  %s22_s0 = smov 4  }
   0x2   :  { %5 = vst [vmem:[#allocation1] sm:$0x3] %v4_v0 }
   0x9   :  { %v10_v1 = vld [vmem:[#allocation1 + $0x1] sm:$0x1]   ;;  %v6_v2 = vld [vmem:[#allocation1] sm:$0x1]  }
   0xa   :  { %11 = vrot.lane.b32.xlu0 %v10_v1, %s22_s0  ;;  %8 = vst.msk [vmem:[#allocation0] sm:$0x1] %vm7_vm0, %v6_v2  }
  0x7c   :  { %v12_v3 = vpop.permute.xlu0 %11  }
  0x7d   :  { %14 = vst.msk [vmem:[#allocation0] sm:$0x1] %vm13_vm1, %v12_v3  }
  0x84   :  { %v18_v4 = vld [vmem:[#allocation0] sm:$0x1] }
  0x85   :  { %20 = vst [vmem:[%s40_s1] sm:$0x1] %v18_v4 }

// kernel: tile.8
= control target key start
LH: loop header
LB: loop body
LE: loop exit
PB: predicated region body
PF: predicated region fallthrough
CT: control target
= control target key end

     0   :  { %s82_s0 = inlined_call_operand.vmem [shape: f32[4,4], index: 0, kind: input, shape index: {}]   ;;  %s83_s1 = inlined_call_operand.vmem [shape: f32[2,4,2,4], index: 1, kind: output, shape index: {}]  }
   0x1   :  { %v4_v0 = vld [vmem:[%s82_s0] ss:$0 sm:$0xff]  ;;  %v27_v1 = vld [vmem:[%s82_s0 + $0x1] ss:$0 sm:$0xff]  ;;  %v30_v2 = vld [vmem:[%s82_s0 + $0x2] ss:$0 sm:$0xff] }
   0x2   :  { %5 = vst [vmem:[%s83_s1] sm:$0x3] %v4_v0  ;;  %26 = vst [vmem:[%s83_s1 + $0x8] sm:$0x3] %v4_v0  ;;  %v33_v3 = vld [vmem:[%s82_s0 + $0x3] ss:$0 sm:$0xff] }
   0x3   :  { %28 = vst [vmem:[%s83_s1 + $0x2] sm:$0x3] %v27_v1  ;;  %29 = vst [vmem:[%s83_s1 + $0xa] sm:$0x3] %v27_v1 }
   0x4   :  { %31 = vst [vmem:[%s83_s1 + $0x4] sm:$0x3] %v30_v2  ;;  %32 = vst [vmem:[%s83_s1 + $0xc] sm:$0x3] %v30_v2 }
   0x5   :  { %34 = vst [vmem:[%s83_s1 + $0x6] sm:$0x3] %v33_v3  ;;  %35 = vst [vmem:[%s83_s1 + $0xe] sm:$0x3] %v33_v3 }

// kernel: tile.9
= control target key start
LH: loop header
LB: loop body
LE: loop exit
PB: predicated region body
PF: predicated region fallthrough
CT: control target
= control target key end

     0   :  { %vm42_vm0 = vcmask 1047556   ;;  %vm44_vm1 = vcmask 31744   ;;  %vm54_vm2 = vcmask 64544   ;;  %s111_s0 = inlined_call_operand.vmem [shape: f32[2,4,2,4], index: 0, kind: input, shape index: {}]   ;;  %s112_s1 = inlined_call_operand.vmem [shape: f32[8,8], index: 1, kind: output, shape index: {}]  }
   0x1   :  { %v62_v0 = vld [vmem:[%s111_s0 + $0xe] sm:$0x3]  ;;  %v63_v1 = vld [vmem:[%s111_s0 + $0xc] sm:$0x3]  ;;  %v64_v2 = vld [vmem:[%s111_s0 + $0xa] sm:$0x3] }
   0x2   :  { %8 = vst [vmem:[#allocation0 + $0x38] sm:$0x3] %v62_v0  ;;  %13 = vst [vmem:[#allocation0 + $0x30] sm:$0x3] %v63_v1  ;;  %v65_v3 = vld [vmem:[%s111_s0 + $0x8] sm:$0x3] }
   0x3   :  { %18 = vst [vmem:[#allocation0 + $0x28] sm:$0x3] %v64_v2  ;;  %v66_v4 = vld [vmem:[%s111_s0 + $0x6] sm:$0x3]  ;;  %v67_v5 = vld [vmem:[%s111_s0 + $0x4] sm:$0x3] }
   0x4   :  { %23 = vst [vmem:[#allocation0 + $0x20] sm:$0x3] %v65_v3  ;;  %28 = vst [vmem:[#allocation0 + $0x18] sm:$0x3] %v66_v4  ;;  %v68_v6 = vld [vmem:[%s111_s0 + $0x2] sm:$0x3] }
   0x5   :  { %33 = vst [vmem:[#allocation0 + $0x10] sm:$0x3] %v67_v5  ;;  %v38_v7 = vld [vmem:[%s111_s0] sm:$0x3]  ;;  %37 = vst [vmem:[#allocation0 + $0x8] sm:$0x3] %v68_v6 }
   0x6   :  { %39 = vst [vmem:[#allocation0] sm:$0x3] %v38_v7  ;;  %s70_s0 = smov 4  }
   0xb   :  { %v41_v8 = vld [vmem:[#allocation0] ss:$8 sm:$0xf0]   ;;  %v49_v9 = vld [vmem:[#allocation0 + $0x1] ss:$8 sm:$0xf0]  }
   0xd   :  { %v40_v10 = vld [vmem:[#allocation0] ss:$8 sm:$0xf]   ;;  %v47_v11 = vld [vmem:[#allocation0 + $0x1] ss:$8 sm:$0xf]  }
   0xe   :  { %v43_v12 = vsel %vm42_vm0, %v41_v8, %v40_v10  ;;  %v51_v13 = vsel %vm42_vm0, %v49_v9, %v47_v11 }
   0xf   :  { %52 = vrot.lane.b32.xlu0 %v51_v13, %s70_s0  ;;  %45 = vst.msk [vmem:[%s112_s1] sm:$0xff] %vm44_vm1, %v43_v12  }
  0x81   :  { %v53_v14 = vpop.permute.xlu0 %52  }
  0x82   :  { %55 = vst.msk [vmem:[%s112_s1] sm:$0xff] %vm54_vm2, %v53_v14  }

// kernel: _cfg_forward.1
= control target key start
LH: loop header
LB: loop body
LE: loop exit
PB: predicated region body
PF: predicated region fallthrough
CT: control target
= control target key end

     0   :  { %v219_v0 = vmov 2   ;;  %v220_v1 = vmov 0   ;;  %v221_v3 = vmov 3   ;;  %v222_v4 = vmov 1   ;;  %s283_s1 = inlined_call_operand.vmem [shape: f32[8,8], index: 1, kind: input, shape index: {}]   ;;  %s284_s2 = inlined_call_operand.vmem [shape: f32[8,1], index: 2, kind: input, shape index: {}]   ;;  %s285_s0 = inlined_call_operand.vmem [shape: f32[8,256], index: 0, kind: input, shape index: {}]   ;;  %s286_s3 = inlined_call_operand.vmem [shape: f32[8,256], index: 3, kind: output, shape index: {}]  }
   0x1   :  { %212 = vset.pattern.permute.xlu1 %v219_v0  ;;  %210 = vset.pattern.permute.xlu0 %v220_v1  ;;  %v14_v2 = vld [vmem:[%s283_s1] sm:$0xff]  ;;  %v223_v5 = vmov 4   ;;  %v224_v6 = vmov 5   ;;  %v225_v8 = vmov 6   ;;  %v226_v9 = vmov 7  }
   0x2   :  { %58 = vperm.xlu1 %212, %v14_v2   ;;  %18 = vperm.xlu0 %210, %v14_v2   ;;  %v181_v7 = vld [vmem:[%s284_s2] sm:$0xff]  ;;  %v22_v10 = vlaneseq }
   0x3   :  { %v15_v12 = vld [vmem:[%s285_s0] ss:$8 sm:$0x3]  ;;  %v195_v13 = vld [vmem:[%s285_s0 + $0x1] ss:$8 sm:$0x3] }
   0x4   :  { %v23_v11 = vshrl.u32 %v22_v10, 7  ;;  %v196_v18 = vld [vmem:[%s285_s0 + $0x2] ss:$8 sm:$0x3] }
   0x5   :  { %v197_v21 = vld [vmem:[%s285_s0 + $0x3] ss:$8 sm:$0x3]  ;;  %v198_v26 = vld [vmem:[%s285_s0 + $0x4] ss:$8 sm:$0x3] }
   0x6   :  { %213 = vset.pattern.permute.xlu1 %v221_v3  ;;  %211 = vset.pattern.permute.xlu0 %v222_v4  ;;  %v24_v14 = vsub.s32 0, %v23_v11  ;;  %v28_v15 = vsub.s32 1, %v23_v11  ;;  %v199_v35 = vld [vmem:[%s285_s0 + $0x5] ss:$8 sm:$0x3] }
   0x7   :  { %79 = vperm.xlu1 %213, %v14_v2   ;;  %37 = vperm.xlu0 %211, %v14_v2   ;;  %v200_v50 = vld [vmem:[%s285_s0 + $0x6] ss:$8 sm:$0x3]  ;;  %v201_v59 = vld [vmem:[%s285_s0 + $0x7] ss:$8 sm:$0x3] }
   0x8   :  { %v25_v19 = vrot.slane %v15_v12, %v24_v14  ;;  %v29_v20 = vrot.slane %v15_v12, %v28_v15  ;;  %v44_v22 = vrot.slane %v195_v13, %v24_v14  ;;  %v48_v23 = vrot.slane %v195_v13, %v28_v15 }
   0x9   :  { %v65_v24 = vrot.slane %v196_v18, %v24_v14  ;;  %v69_v25 = vrot.slane %v196_v18, %v28_v15  ;;  %v86_v28 = vrot.slane %v197_v21, %v24_v14  ;;  %v90_v29 = vrot.slane %v197_v21, %v28_v15 }
   0xa   :  { %v107_v36 = vrot.slane %v198_v26, %v24_v14  ;;  %v111_v37 = vrot.slane %v198_v26, %v28_v15  ;;  %v128_v42 = vrot.slane %v199_v35, %v24_v14  ;;  %v132_v43 = vrot.slane %v199_v35, %v28_v15 }
   0xb   :  { %214 = vset.pattern.permute.xlu1 %v223_v5  ;;  %215 = vset.pattern.permute.xlu0 %v224_v6  ;;  %v149_v57 = vrot.slane %v200_v50, %v24_v14  ;;  %v153_v58 = vrot.slane %v200_v50, %v28_v15  ;;  %v170_v63 = vrot.slane %v201_v59, %v24_v14 }
   0xc   :  { %100 = vperm.xlu1 %214, %v14_v2   ;;  %121 = vperm.xlu0 %215, %v14_v2   ;;  %v174_v0 = vrot.slane %v201_v59, %v28_v15 }
  0x10   :  { %216 = vset.pattern.permute.xlu1 %v225_v8  ;;  %218 = vset.pattern.permute.xlu0 %v220_v1 }
  0x11   :  { %142 = vperm.xlu1 %216, %v14_v2   ;;  %184 = vperm.xlu0 %218, %v181_v7  }
  0x15   :  { %217 = vset.pattern.permute.xlu1 %v226_v9 }
  0x16   :  { %163 = vperm.xlu1 %217, %v14_v2  }
  0x81   :  { %v59_v16 = vpop.permute.xlu1 %58  ;;  %v19_v17 = vpop.permute.xlu0 %18 }
  0x82   :  { %v32_v31 = vmul.f32 %v25_v19, %v19_v17  ;;  %v33_v32 = vmul.f32 %v29_v20, %v19_v17  ;;  %v72_v38 = vmul.f32 %v65_v24, %v59_v16  ;;  %v73_v39 = vmul.f32 %v69_v25, %v59_v16 }
  0x86   :  { %v80_v27 = vpop.permute.xlu1 %79  ;;  %v38_v30 = vpop.permute.xlu0 %37 }
  0x87   :  { %v51_v33 = vmul.f32 %v44_v22, %v38_v30  ;;  %v52_v34 = vmul.f32 %v48_v23, %v38_v30  ;;  %v93_v44 = vmul.f32 %v86_v28, %v80_v27  ;;  %v94_v45 = vmul.f32 %v90_v29, %v80_v27 }
  0x89   :  { %v53_v40 = vadd.f32 %v51_v33, %v32_v31  ;;  %v54_v41 = vadd.f32 %v52_v34, %v33_v32 }
  0x8b   :  { %v74_v46 = vadd.f32 %v72_v38, %v53_v40  ;;  %v75_v47 = vadd.f32 %v73_v39, %v54_v41  ;;  %v101_v48 = vpop.permute.xlu1 %100  ;;  %v122_v49 = vpop.permute.xlu0 %121 }
  0x8c   :  { %v114_v51 = vmul.f32 %v107_v36, %v101_v48  ;;  %v115_v52 = vmul.f32 %v111_v37, %v101_v48  ;;  %v135_v55 = vmul.f32 %v128_v42, %v122_v49  ;;  %v136_v56 = vmul.f32 %v132_v43, %v122_v49 }
  0x8d   :  { %v95_v53 = vadd.f32 %v93_v44, %v74_v46  ;;  %v96_v54 = vadd.f32 %v94_v45, %v75_v47 }
  0x8f   :  { %v116_v60 = vadd.f32 %v114_v51, %v95_v53  ;;  %v117_v61 = vadd.f32 %v115_v52, %v96_v54 }
  0x90   :  { %v143_v62 = vpop.permute.xlu1 %142  ;;  %v185_v10 = vpop.permute.xlu0 %184 }
  0x91   :  { %v137_v1 = vadd.f32 %v135_v55, %v116_v60  ;;  %v138_v2 = vadd.f32 %v136_v56, %v117_v61  ;;  %v156_v3 = vmul.f32 %v149_v57, %v143_v62  ;;  %v157_v4 = vmul.f32 %v153_v58, %v143_v62 }
  0x93   :  { %v158_v6 = vadd.f32 %v156_v3, %v137_v1  ;;  %v159_v7 = vadd.f32 %v157_v4, %v138_v2 }
  0x95   :  { %v164_v5 = vpop.permute.xlu1 %163 }
  0x96   :  { %v177_v8 = vmul.f32 %v170_v63, %v164_v5  ;;  %v178_v9 = vmul.f32 %v174_v0, %v164_v5 }
  0x98   :  { %v179_v11 = vadd.f32 %v177_v8, %v158_v6  ;;  %v180_v12 = vadd.f32 %v178_v9, %v159_v7 }
  0x9a   :  { %v187_v13 = vadd.f32 %v185_v10, %v179_v11  ;;  %v188_v16 = vadd.f32 %v185_v10, %v180_v12 }
  0x9c   :  { %189 = vst [vmem:[%s286_s3] sm:$0xff] %v187_v13  ;;  %190 = vst [vmem:[%s286_s3 + $0x8] sm:$0xff] %v188_v16 }

</bundles_post_ra>
